<compile_context>
chip_gen: v6e
topology: v6e:2x2x1
jax: 0.10.0
libtpu: 0.0.40
codegen_flags: <defaults>
</compile_context>

<pallas_src>
import math

import jax
import jax.numpy as jnp
from jax.experimental import pallas as pl
from jax.experimental.pallas import tpu as pltpu


def _round_up(x, m):
    return ((x + m - 1) // m) * m


def _cdiv(a, b):
    return (a + b - 1) // b


def _make_fused_kernel(num_hidden_levels, matmul_dtype):
    """Fused kernel body.

    Ref order:
      (x_ref,
       W_0, b_0, ..., W_{L-1}, b_{L-1},   # packed block-diagonal hidden levels
       W_final, b_final,                  # batched (C_pad, P) final heads
       out_ref)

    Hidden levels: one MXU matmul each (matmul_dtype operands, f32 accumulation)
    + f32 bias + ReLU.  Final: one (TB, C_pad) x (C_pad, P) matmul + f32 bias,
    single (TB, P) store.
    """

    def kernel(x_ref, *refs):
        out_ref = refs[-1]
        params = refs[:-1]

        x = x_ref[...]
        h = x if x.dtype == matmul_dtype else x.astype(matmul_dtype)

        idx = 0
        for _ in range(num_hidden_levels):
            w = params[idx][...]          # (in_pad, out_pad), matmul_dtype
            b = params[idx + 1][...]      # (1, out_pad), float32
            idx += 2
            acc = jnp.dot(h, w, preferred_element_type=jnp.float32)
            acc = jnp.maximum(acc + b, 0.0)
            h = acc if acc.dtype == matmul_dtype else acc.astype(matmul_dtype)

        wf = params[idx][...]             # (in_pad, P), matmul_dtype
        bf = params[idx + 1][...]         # (1, P), float32
        out = jnp.dot(h, wf, preferred_element_type=jnp.float32) + bf
        out_ref[...] = out.astype(out_ref.dtype)

    return kernel


class PropertyNetworkPredictionModulePallas:
    """JAX/Pallas port of PropertyNetworkPredictionModule (forward only)."""

    def __init__(self, latent_dim, property_dim, property_network_hidden_dim_list,
                 dtype=jnp.float32, weights=(0.5, 0.5), key=None,
                 matmul_dtype=jnp.bfloat16, batch_tile=1024):
        if len(property_network_hidden_dim_list) != property_dim:
            raise ValueError(
                "Insert the property network structure corresponding to the "
                "property dimension")
        if len(weights) != property_dim:
            raise ValueError(
                "Insert the weights corresponding to the property dimension")
        if property_dim < 1:
            raise ValueError("There is no property target")

        self.latent_dim = latent_dim
        self.property_dim = property_dim
        self.dtype = dtype
        # bf16 MXU operands by default (f32 accumulation); pass jnp.float32 for
        # the exact path.
        self.matmul_dtype = matmul_dtype
        self.batch_tile = int(batch_tile)

        w = jnp.asarray(weights, dtype=dtype)
        # f.normalize(p=1, dim=0) — not consumed in forward (matches PyTorch).
        self.normalized_weights_tensor = w / jnp.maximum(
            jnp.sum(jnp.abs(w)), 1e-12)

        if key is None:
            key = jax.random.PRNGKey(0)

        # Per-network layers: W stored as (in, out) (transpose of PyTorch),
        # b as (1, out).  nn.Linear default init U(-1/sqrt(fan_in), 1/sqrt(fan_in)).
        hidden_lists = [list(d) for d in property_network_hidden_dim_list]
        self.networks = []
        for dim_list in hidden_lists:
            layer_sizes = [latent_dim] + dim_list + [1]
            layers = []
            for in_d, out_d in zip(layer_sizes[:-1], layer_sizes[1:]):
                key, kw, kb = jax.random.split(key, 3)
                bound = 1.0 / math.sqrt(in_d)
                W = jax.random.uniform(kw, (in_d, out_d), dtype=dtype,
                                       minval=-bound, maxval=bound)
                b = jax.random.uniform(kb, (1, out_d), dtype=dtype,
                                       minval=-bound, maxval=bound)
                layers.append((W, b))
            self.networks.append(layers)

        self._build_packed_params(hidden_lists)

    # ---- packing: block-diagonal hidden levels + batched final heads --------

    def _build_packed_params(self, hidden_lists):
        P = self.property_dim
        depths = [len(d) for d in hidden_lists]
        L = max(depths)
        if L > 0 and any(d == 0 for d in depths):
            # TODO(synk): support mixing zero-hidden-layer property networks with
            # deeper ones in the packed (block-diagonal) formulation.
            raise ValueError(
                "Mixing property networks with and without hidden layers is not "
                "supported by the fused kernel")
        self._num_hidden_levels = L

        # Identity-padded per-network output width at every hidden level.
        lvl_widths = [(list(d) + [d[-1]] * (L - len(d))) if L > 0 else []
                      for d in hidden_lists]

        def offsets(ws):
            offs, s = [], 0
            for ww in ws:
                offs.append(s)
                s += ww
            return offs, s

        packed = []
        prev_offs, prev_widths, prev_pad = None, None, None
        for l in range(L):
            out_widths = [lvl_widths[p][l] for p in range(P)]
            out_offs, out_total = offsets(out_widths)
            out_pad = _round_up(out_total, 128)       # lane-dense N
            in_pad = self.latent_dim if l == 0 else prev_pad

            W = jnp.zeros((in_pad, out_pad), dtype=jnp.float32)
            b = jnp.zeros((1, out_pad), dtype=jnp.float32)
            for p in range(P):
                c0, cw = out_offs[p], out_widths[p]
                if l == 0:
                    Wp, bp = self.networks[p][0]
                    W = W.at[:, c0:c0 + cw].set(Wp.astype(jnp.float32))
                    b = b.at[:, c0:c0 + cw].set(bp.astype(jnp.float32))
                else:
                    r0, rw = prev_offs[p], prev_widths[p]
                    if l < depths[p]:
                        Wp, bp = self.networks[p][l]
                        W = W.at[r0:r0 + rw, c0:c0 + cw].set(
                            Wp.astype(jnp.float32))
                        b = b.at[:, c0:c0 + cw].set(bp.astype(jnp.float32))
                    else:
                        # Identity pass-through for shallower nets: input is
                        # post-ReLU (non-negative) so relu(h @ I + 0) == h.
                        W = W.at[r0:r0 + rw, c0:c0 + cw].set(
                            jnp.eye(rw, dtype=jnp.float32))
            packed.append(W.astype(self.matmul_dtype))   # pre-cast once
            packed.append(b)                              # bias stays f32
            prev_offs, prev_widths, prev_pad = out_offs, out_widths, out_pad

        # Batched final out_dim==1 heads: one (in_pad, P) matmul for all nets.
        fin_pad = self.latent_dim if L == 0 else prev_pad
        Wf = jnp.zeros((fin_pad, P), dtype=jnp.float32)
        bf = jnp.zeros((1, P), dtype=jnp.float32)
        for p in range(P):
            Wp, bp = self.networks[p][-1]     # (in_w, 1), (1, 1)
            if L == 0:
                Wf = Wf.at[:self.latent_dim, p:p + 1].set(Wp.astype(jnp.float32))
            else:
                r0, rw = prev_offs[p], prev_widths[p]
                Wf = Wf.at[r0:r0 + rw, p:p + 1].set(Wp.astype(jnp.float32))
            bf = bf.at[0, p].set(bp[0, 0].astype(jnp.float32))
        packed.append(Wf.astype(self.matmul_dtype))
        packed.append(bf)

        self._packed_params = packed

    # ---- tiling ---------------------------------------------------------------

    def _choose_tiling(self, B):
        # Padding-aware tile: never overshoot by ~a full tile.
        num_tiles = max(1, _cdiv(B, self.batch_tile))
        TB = _round_up(_cdiv(B, num_tiles), 8)
        # Keep >= 2 grid steps when possible so v7x's two TensorCores both get
        # work on the "parallel" axis (negligible cost on 1-TC v5e/v6e).
        if num_tiles == 1 and B >= 16:
            num_tiles = 2
            TB = _round_up(_cdiv(B, num_tiles), 8)
        return TB, TB * num_tiles, num_tiles

    # ---- forward ----------------------------------------------------------------

    def __call__(self, latent_points):
        B, D = latent_points.shape
        assert D == self.latent_dim, (D, self.latent_dim)
        P = self.property_dim

        TB, B_pad, n_tiles = self._choose_tiling(B)
        x = latent_points
        if B_pad != B:
            x = jnp.pad(x, ((0, B_pad - B), (0, 0)))

        # Activations stream over the batch grid; weights/biases use constant
        # index_maps so they stay VMEM-resident across grid steps.
        in_specs = [pl.BlockSpec((TB, D), lambda i: (i, 0))]
        for prm in self._packed_params:
            in_specs.append(pl.BlockSpec(prm.shape, lambda i: (0, 0)))
        out_specs = pl.BlockSpec((TB, P), lambda i: (i, 0))

        kernel = _make_fused_kernel(self._num_hidden_levels, self.matmul_dtype)

        out = pl.pallas_call(
            kernel,
            out_shape=jax.ShapeDtypeStruct((B_pad, P), latent_points.dtype),
            grid=(n_tiles,),
            in_specs=in_specs,
            out_specs=out_specs,
            compiler_params=pltpu.CompilerParams(
                dimension_semantics=("parallel",)),
        )(x, *self._packed_params)

        if B_pad != B:
            out = out[:B]
        return out


def _ref_forward(x, networks):
    """Pure-JAX reference (mathematically identical to the PyTorch module)."""
    x32 = x.astype(jnp.float32)
    preds = []
    for layers in networks:
        h = x32
        n = len(layers)
        for i, (W, b) in enumerate(layers):
            h = jnp.dot(h, W.astype(jnp.float32),
                        precision=jax.lax.Precision.HIGHEST) + b.astype(jnp.float32)
            if i < n - 1:
                h = jnp.maximum(h, 0.0)
        preds.append(h)
    return jnp.concatenate(preds, axis=-1).astype(x.dtype)


if __name__ == "__main__":
    key = jax.random.PRNGKey(0)
    key, k_x, k_x2, k_params = jax.random.split(key, 4)

    batch = 8
    latent_dim = 32
    property_dim = 2
    hidden_dim_list = [[32, 16], [24]]

    # Fast path: bf16 MXU operands (default), f32 accumulation.
    module = PropertyNetworkPredictionModulePallas(
        latent_dim=latent_dim,
        property_dim=property_dim,
        property_network_hidden_dim_list=hidden_dim_list,
        dtype=jnp.float32,
        weights=(0.5, 0.5),
        key=k_params,
    )
    # Exact path: f32 MXU operands, same parameters (same key).
    module_f32 = PropertyNetworkPredictionModulePallas(
        latent_dim=latent_dim,
        property_dim=property_dim,
        property_network_hidden_dim_list=hidden_dim_list,
        dtype=jnp.float32,
        weights=(0.5, 0.5),
        key=k_params,
        matmul_dtype=jnp.float32,
    )

    latent_points = jax.random.normal(k_x, (batch, latent_dim), dtype=jnp.float32)
    ref = _ref_forward(latent_points, module.networks)

    out_bf16 = jax.block_until_ready(module(latent_points))
    assert out_bf16.shape == (batch, property_dim), out_bf16.shape
    assert jnp.allclose(out_bf16, ref, atol=1e-1), (
        "bf16 MXU path mismatch vs JAX reference")

    out_f32 = jax.block_until_ready(module_f32(latent_points))
    assert out_f32.shape == (batch, property_dim), out_f32.shape
    assert jnp.allclose(out_f32, ref, atol=1e-4, rtol=1e-4), (
        "f32 MXU path mismatch vs JAX reference")

    # Non-multiple-of-8 batch (row padding + slice) exercising the same kernel.
    batch2 = 13
    latent_points2 = jax.random.normal(k_x2, (batch2, latent_dim),
                                       dtype=jnp.float32)
    ref2 = _ref_forward(latent_points2, module_f32.networks)
    out2 = jax.block_until_ready(module_f32(latent_points2))
    assert out2.shape == (batch2, property_dim), out2.shape
    assert jnp.allclose(out2, ref2, atol=1e-4, rtol=1e-4), (
        "padded-batch mismatch vs JAX reference")

    print("KERNEL_OK")
</pallas_src>

<mosaic_0001>
module attributes {stable_mosaic.version = 11 : i64} {
  func.func @kernel(%arg0: i32, %arg1: memref<8x32xf32, #tpu.memory_space<vmem>>, %arg2: memref<32x128xbf16, #tpu.memory_space<vmem>>, %arg3: memref<1x128xf32, #tpu.memory_space<vmem>>, %arg4: memref<128x128xbf16, #tpu.memory_space<vmem>>, %arg5: memref<1x128xf32, #tpu.memory_space<vmem>>, %arg6: memref<128x2xbf16, #tpu.memory_space<vmem>>, %arg7: memref<1x2xf32, #tpu.memory_space<vmem>>, %arg8: memref<8x2xf32, #tpu.memory_space<vmem>>) attributes {dimension_semantics = [#tpu.dimension_semantics<parallel>], iteration_bounds = array<i64: 1>, scalar_prefetch = 0 : i64, scratch_operands = 0 : i64, tpu.core_type = #tpu.core_type<tc>, window_params = [{transform_indices = @transform_0, window_bounds = array<i64: 8, 32>}, {pipeline_mode = #tpu.pipeline_mode<synchronous>, transform_indices = @transform_1, window_bounds = array<i64: 32, 128>}, {pipeline_mode = #tpu.pipeline_mode<synchronous>, transform_indices = @transform_2, window_bounds = array<i64: 1, 128>}, {pipeline_mode = #tpu.pipeline_mode<synchronous>, transform_indices = @transform_3, window_bounds = array<i64: 128, 128>}, {pipeline_mode = #tpu.pipeline_mode<synchronous>, transform_indices = @transform_4, window_bounds = array<i64: 1, 128>}, {pipeline_mode = #tpu.pipeline_mode<synchronous>, transform_indices = @transform_5, window_bounds = array<i64: 128, 2>}, {pipeline_mode = #tpu.pipeline_mode<synchronous>, transform_indices = @transform_6, window_bounds = array<i64: 1, 2>}, {transform_indices = @transform_7, window_bounds = array<i64: 8, 2>}]} {
    %c0 = arith.constant 0 : index
    %c0_0 = arith.constant 0 : index
    %0 = vector.load %arg1[%c0, %c0_0] : memref<8x32xf32, #tpu.memory_space<vmem>>, vector<8x32xf32>
    %1 = arith.truncf %0 : vector<8x32xf32> to vector<8x32xbf16>
    %c0_1 = arith.constant 0 : index
    %c0_2 = arith.constant 0 : index
    %2 = vector.load %arg2[%c0_1, %c0_2] : memref<32x128xbf16, #tpu.memory_space<vmem>>, vector<32x128xbf16>
    %c0_3 = arith.constant 0 : index
    %c0_4 = arith.constant 0 : index
    %3 = vector.load %arg3[%c0_3, %c0_4] : memref<1x128xf32, #tpu.memory_space<vmem>>, vector<1x128xf32>
    %cst = arith.constant dense<0.000000e+00> : vector<8x128xf32>
    %4 = tpu.matmul %1, %2, %cst {dimension_numbers = #tpu.dot_dimension_numbers<[1], [0], [0], [1], [0, 0, 1, 1], [], []>} : vector<8x32xbf16>, vector<32x128xbf16>, vector<8x128xf32> -> vector<8x128xf32>
    %5 = vector.broadcast %3 : vector<1x128xf32> to vector<8x128xf32>
    %6 = arith.addf %4, %5 : vector<8x128xf32>
    %cst_5 = arith.constant 0.000000e+00 : f32
    %7 = vector.broadcast %cst_5 : f32 to vector<8x128xf32>
    %8 = arith.maximumf %6, %7 : vector<8x128xf32>
    %9 = arith.truncf %8 : vector<8x128xf32> to vector<8x128xbf16>
    %c0_6 = arith.constant 0 : index
    %c0_7 = arith.constant 0 : index
    %10 = vector.load %arg4[%c0_6, %c0_7] : memref<128x128xbf16, #tpu.memory_space<vmem>>, vector<128x128xbf16>
    %c0_8 = arith.constant 0 : index
    %c0_9 = arith.constant 0 : index
    %11 = vector.load %arg5[%c0_8, %c0_9] : memref<1x128xf32, #tpu.memory_space<vmem>>, vector<1x128xf32>
    %cst_10 = arith.constant dense<0.000000e+00> : vector<8x128xf32>
    %12 = tpu.matmul %9, %10, %cst_10 {dimension_numbers = #tpu.dot_dimension_numbers<[1], [0], [0], [1], [0, 0, 1, 1], [], []>} : vector<8x128xbf16>, vector<128x128xbf16>, vector<8x128xf32> -> vector<8x128xf32>
    %13 = vector.broadcast %11 : vector<1x128xf32> to vector<8x128xf32>
    %14 = arith.addf %12, %13 : vector<8x128xf32>
    %cst_11 = arith.constant 0.000000e+00 : f32
    %15 = vector.broadcast %cst_11 : f32 to vector<8x128xf32>
    %16 = arith.maximumf %14, %15 : vector<8x128xf32>
    %17 = arith.truncf %16 : vector<8x128xf32> to vector<8x128xbf16>
    %c0_12 = arith.constant 0 : index
    %c0_13 = arith.constant 0 : index
    %18 = vector.load %arg6[%c0_12, %c0_13] : memref<128x2xbf16, #tpu.memory_space<vmem>>, vector<128x2xbf16>
    %c0_14 = arith.constant 0 : index
    %c0_15 = arith.constant 0 : index
    %19 = vector.load %arg7[%c0_14, %c0_15] : memref<1x2xf32, #tpu.memory_space<vmem>>, vector<1x2xf32>
    %cst_16 = arith.constant dense<0.000000e+00> : vector<8x2xf32>
    %20 = tpu.matmul %17, %18, %cst_16 {dimension_numbers = #tpu.dot_dimension_numbers<[1], [0], [0], [1], [0, 0, 1, 1], [], []>} : vector<8x128xbf16>, vector<128x2xbf16>, vector<8x2xf32> -> vector<8x2xf32>
    %21 = vector.broadcast %19 : vector<1x2xf32> to vector<8x2xf32>
    %22 = arith.addf %20, %21 : vector<8x2xf32>
    %c0_17 = arith.constant 0 : index
    %c0_18 = arith.constant 0 : index
    %23 = vector.load %arg8[%c0_17, %c0_18] : memref<8x2xf32, #tpu.memory_space<vmem>>, vector<8x2xf32>
    tpu.vector_store %arg8[%c0_17, %c0_18], %22 {strides = array<i32>} : memref<8x2xf32, #tpu.memory_space<vmem>>, vector<8x2xf32>,
    return
  }
  func.func @transform_0(%arg0: i32) -> (i32, i32) {
    %c0_i32 = arith.constant 0 : i32
    %c0_i32_0 = arith.constant 0 : i32
    return %arg0, %c0_i32 : i32, i32
  }
  func.func @transform_1(%arg0: i32) -> (i32, i32) {
    %c0_i32 = arith.constant 0 : i32
    %c0_i32_0 = arith.constant 0 : i32
    %c0_i32_1 = arith.constant 0 : i32
    return %c0_i32, %c0_i32_0 : i32, i32
  }
  func.func @transform_2(%arg0: i32) -> (i32, i32) {
    %c0_i32 = arith.constant 0 : i32
    %c0_i32_0 = arith.constant 0 : i32
    %c0_i32_1 = arith.constant 0 : i32
    return %c0_i32, %c0_i32_0 : i32, i32
  }
  func.func @transform_3(%arg0: i32) -> (i32, i32) {
    %c0_i32 = arith.constant 0 : i32
    %c0_i32_0 = arith.constant 0 : i32
    %c0_i32_1 = arith.constant 0 : i32
    return %c0_i32, %c0_i32_0 : i32, i32
  }
  func.func @transform_4(%arg0: i32) -> (i32, i32) {
    %c0_i32 = arith.constant 0 : i32
    %c0_i32_0 = arith.constant 0 : i32
    %c0_i32_1 = arith.constant 0 : i32
    return %c0_i32, %c0_i32_0 : i32, i32
  }
  func.func @transform_5(%arg0: i32) -> (i32, i32) {
    %c0_i32 = arith.constant 0 : i32
    %c0_i32_0 = arith.constant 0 : i32
    %c0_i32_1 = arith.constant 0 : i32
    return %c0_i32, %c0_i32_0 : i32, i32
  }
  func.func @transform_6(%arg0: i32) -> (i32, i32) {
    %c0_i32 = arith.constant 0 : i32
    %c0_i32_0 = arith.constant 0 : i32
    %c0_i32_1 = arith.constant 0 : i32
    return %c0_i32, %c0_i32_0 : i32, i32
  }
  func.func @transform_7(%arg0: i32) -> (i32, i32) {
    %c0_i32 = arith.constant 0 : i32
    %c0_i32_0 = arith.constant 0 : i32
    return %arg0, %c0_i32 : i32, i32
  }
}

</mosaic_0001>

<bundles_post_ra>
// kernel: tpu_custom_call.1
= control target key start
LH: loop header
LB: loop body
LE: loop exit
PB: predicated region body
PF: predicated region fallthrough
CT: control target
= control target key end

     0   :  { %12 = vsyncpa [#allocation3], 0  ;;  %s651_s0 = inlined_call_operand.hbm [shape: f32[8,32], index: 0, kind: input, shape index: {}]   ;;  %s652_s1 = inlined_call_operand.hbm [shape: bf16[32,128], index: 1, kind: input, shape index: {}]   ;;  %s653_s2 = inlined_call_operand.vmem [shape: f32[1,128], index: 2, kind: input, shape index: {}]   ;;  %s654_s3 = inlined_call_operand.vmem [shape: bf16[128,128], index: 3, kind: input, shape index: {}]   ;;  %s655_s4 = inlined_call_operand.vmem [shape: f32[1,128], index: 4, kind: input, shape index: {}]   ;;  %s656_s5 = inlined_call_operand.vmem [shape: bf16[128,2], index: 5, kind: input, shape index: {}]   ;;  %s657_s6 = inlined_call_operand.vmem [shape: f32[1,2], index: 6, kind: input, shape index: {}]   ;;  %s658_s7 = inlined_call_operand.vmem [shape: f32[8,2], index: 7, kind: output, shape index: {}]  }
   0x1   :  { %13 = vsyncpa [#allocation5], 0  ;;  %s515_s24 = smov [#allocation2]   ;;  %s516_s26 = smov [#allocation4]  }
   0x2   :  { %s20_s25 = sshll.u32 %s515_s24, 4  ;;  %s29_s27 = sshll.u32 %s516_s26, 4  ;;  %s21_s25 = int_to_ptr.vmem [resolvable:$true] %s20_s25  ;;  %s30_s27 = int_to_ptr.vmem [resolvable:$true] %s29_s27 }
   0x3   :  { %s479_s28 = scalar_lea.vmem %s21_s25, 128  ;;  %p484_p1 = scmp.lt.s32.totalorder %s21_s25, %s21_s25 }
   0x4   :  { %p480_p0 = scmp.ne.s32.totalorder %s21_s25, %s479_s28  ;;  %p485_p2 = scmp.lt.s32.totalorder %s479_s28, %s479_s28 }
   0x6   :  { %p486_p3 = por %p485_p2, %p484_p1 }
   0x8   :  { %p487_p4 = pnand %p486_p3, %p480_p0 }
   0xa   :  { %490 = shalt.err (!%p487_p4)
}
   0xb   :  { %23 = dma.hbm_to_vmem [thread:$0]  %s651_s0, 128, %s21_s25, [#allocation3]  }
   0xc   :  { %s499_s8 = scalar_lea.vmem %s30_s27, 256  ;;  %p504_p6 = scmp.lt.s32.totalorder %s30_s27, %s30_s27 }
   0xd   :  { %p500_p5 = scmp.ne.s32.totalorder %s30_s27, %s499_s8  ;;  %p505_p7 = scmp.lt.s32.totalorder %s499_s8, %s499_s8 }
   0xf   :  { %p506_p8 = por %p505_p7, %p504_p6 }
  0x11   :  { %p507_p9 = pnand %p506_p8, %p500_p5 }
  0x13   :  { %510 = shalt.err (!%p507_p9)
}
  0x14   :  { %s517_s9 = smov 64   ;;  %s518_s10 = smov 4  }
  0x15   :  { %35 = dma.hbm_to_vmem [thread:$0]  %s652_s1, 256, %s30_s27, [#allocation5], %s517_s9, %s517_s9, %s518_s10  }
  0x16   :  { %511 = dma.done.wait [#allocation3], 128  }
  0x17   :  { %512 = vsyncadd [#allocation3], 4294967168 }
  0x18   :  { %513 = dma.done.wait [#allocation5], 256  }
  0x19   :  { %514 = vsyncadd [#allocation5], 4294967040  ;;  %v519_v0 = vmov 0.0   ;;  %vm520_vm0 = vmmov 0   ;;  %v453_v1 = vld [vmem:[#allocation4 + $0x8] sm:$0xff]   ;;  %v454_v2 = vld [vmem:[#allocation4] sm:$0xff]  }
  0x1a   :  { %399 = vmatprep.subr.bf16.mxu0 %v519_v0  ;;  %403 = vmatprep.mubr.msk.bf16.mxu0 %vm520_vm0, %v519_v0  ;;  %v53_v3 = vld [vmem:[#allocation2] sm:$0xff]  ;;  %v455_v4 = vld [vmem:[%s654_s3 + $0x38] sm:$0xff]   ;;  %v456_v6 = vld [vmem:[%s654_s3 + $0x30] sm:$0xff]   ;;  %vm78_vm1 = vcmask 261120   ;;  %vm348_vm2 = vcmask 15360  }
  0x1b   :  { %407 = vmatprep.subr.bf16.mxu1 %v519_v0  ;;  %423 = vmatprep.mubr.msk.bf16.mxu1 %vm520_vm0, %v519_v0  ;;  %v54_v5 = vpack.c.bf16 %v53_v3, %v53_v3  ;;  %v457_v7 = vld [vmem:[%s654_s3 + $0x28] sm:$0xff]   ;;  %v458_v8 = vld [vmem:[%s654_s3 + $0x20] sm:$0xff]   ;;  %v459_v9 = vld [vmem:[%s654_s3 + $0x18] sm:$0xff]  }
  0x1c   :  { %400 = vmatpush3.bf16.msra.mxu0 %v453_v1  ;;  %408 = vmatpush3.bf16.msra.mxu1 %v455_v4  ;;  %v460_v10 = vld [vmem:[%s654_s3 + $0x10] sm:$0xff]   ;;  %v461_v11 = vld [vmem:[%s654_s3 + $0x8] sm:$0xff]   ;;  %v462_v12 = vld [vmem:[%s654_s3] sm:$0xff]  }
  0x1d   :  { %401 = vmatprep.subr.bf16.mxu0 %v519_v0  ;;  %409 = vmatprep.subr.bf16.mxu1 %v519_v0  ;;  %v463_v13 = vld [vmem:[%s656_s5 + $0x38] sm:$0xff]   ;;  %v464_v14 = vld [vmem:[%s656_s5 + $0x30] sm:$0xff]   ;;  %v465_v15 = vld [vmem:[%s656_s5 + $0x28] sm:$0xff]  }
  0x1e   :  { %v466_v16 = vld [vmem:[%s656_s5 + $0x20] sm:$0xff]   ;;  %v467_v17 = vld [vmem:[%s656_s5 + $0x18] sm:$0xff]   ;;  %v468_v18 = vld [vmem:[%s656_s5 + $0x10] sm:$0xff]  }
  0x1f   :  { %v356_v19 = vld [vmem:[%s653_s2] ss:$0 sm:$0xff]  ;;  %v469_v27 = vld [vmem:[%s656_s5 + $0x8] sm:$0xff]  }
  0x20   :  { %402 = vmatpush3.bf16.msra.mxu0 %v454_v2  ;;  %410 = vmatpush3.bf16.msra.mxu1 %v456_v6  ;;  %v470_v28 = vld [vmem:[%s656_s5] sm:$0xff]  }
  0x21   :  { %427 = vmatprep.subr.bf16.mxu0 %v519_v0  ;;  %411 = vmatprep.subr.bf16.mxu1 %v519_v0  ;;  %v360_v29 = vld [vmem:[%s655_s4] ss:$0 sm:$0xff] }
  0x22   :  { %v369_v37 = vld [vmem:[%s657_s6] ss:$0 sm:$0xff] }
  0x23   :  { %404 = vmatmul.mubr.msk.bf16.vlgmr.msra.gmra.mxu0 %vm78_vm1, %v54_v5 }
  0x24   :  { %443 = vmatprep.mubr.msk.bf16.mxu0 %vm520_vm0, %v519_v0  ;;  %412 = vmatpush3.bf16.msra.mxu1 %v457_v7 }
  0x25   :  { %413 = vmatprep.subr.bf16.mxu1 %v519_v0  ;;  %428 = vmatpush3.bf16.msra.mxu0 %v463_v13 }
  0x26   :  { %429 = vmatprep.subr.bf16.mxu0 %v519_v0 }
  0x28   :  { %414 = vmatpush3.bf16.msra.mxu1 %v458_v8 }
  0x29   :  { %415 = vmatprep.subr.bf16.mxu1 %v519_v0  ;;  %430 = vmatpush3.bf16.msra.mxu0 %v464_v14 }
  0x2a   :  { %431 = vmatprep.subr.bf16.mxu0 %v519_v0 }
  0x2c   :  { %416 = vmatpush3.bf16.msra.mxu1 %v459_v9 }
  0x2d   :  { %417 = vmatprep.subr.bf16.mxu1 %v519_v0  ;;  %432 = vmatpush3.bf16.msra.mxu0 %v465_v15 }
  0x2e   :  { %433 = vmatprep.subr.bf16.mxu0 %v519_v0 }
  0x30   :  { %418 = vmatpush3.bf16.msra.mxu1 %v460_v10 }
  0x31   :  { %419 = vmatprep.subr.bf16.mxu1 %v519_v0  ;;  %434 = vmatpush3.bf16.msra.mxu0 %v466_v16 }
  0x32   :  { %435 = vmatprep.subr.bf16.mxu0 %v519_v0 }
  0x34   :  { %420 = vmatpush3.bf16.msra.mxu1 %v461_v11 }
  0x35   :  { %421 = vmatprep.subr.bf16.mxu1 %v519_v0  ;;  %436 = vmatpush3.bf16.msra.mxu0 %v467_v17 }
  0x36   :  { %437 = vmatprep.subr.bf16.mxu0 %v519_v0 }
  0x38   :  { %422 = vmatpush3.bf16.msra.mxu1 %v462_v12 }
  0x39   :  { %438 = vmatpush3.bf16.msra.mxu0 %v468_v18 }
  0x3a   :  { %439 = vmatprep.subr.bf16.mxu0 %v519_v0 }
  0x3d   :  { %440 = vmatpush3.bf16.msra.mxu0 %v469_v27 }
  0x3e   :  { %441 = vmatprep.subr.bf16.mxu0 %v519_v0 }
  0x41   :  { %442 = vmatpush3.bf16.msra.mxu0 %v470_v28 }
  0xe3   :  { %v116_v20 = vpop.f32.mrf.mxu0 }
  0xe4   :  { %v117_v21 = vadd.f32 %v356_v19, %v116_v20 }
  0xe5   :  { %v405_v22 = vpop.f32.mrf.mxu0 }
  0xe6   :  { %v122_v23 = vmax.f32 %v117_v21, 0.0 }
  0xe7   :  { %v119_v24 = vpop.f32.mrf.mxu0 }
  0xe8   :  { %v123_v25 = vpack.c.bf16 %v122_v23, %v122_v23 }
  0xe9   :  { %v406_v26 = vpop.f32.mrf.mxu0 }
  0xea   :  { %424 = vmatmul.mubr.bf16.vlgmr.msra.gmra.mxu1 %v123_v25 }
 0x1aa   :  { %v229_v30 = vpop.f32.mrf.mxu1 }
 0x1ab   :  { %v230_v31 = vadd.f32 %v360_v29, %v229_v30 }
 0x1ac   :  { %v425_v32 = vpop.f32.mrf.mxu1 }
 0x1ad   :  { %v235_v33 = vmax.f32 %v230_v31, 0.0 }
 0x1ae   :  { %v232_v34 = vpop.f32.mrf.mxu1 }
 0x1af   :  { %v236_v35 = vpack.c.bf16 %v235_v33, %v235_v33 }
 0x1b0   :  { %v426_v36 = vpop.f32.mrf.mxu1 }
 0x1b1   :  { %444 = vmatmul.mubr.bf16.vlgmr.msra.gmra.mxu0 %v236_v35 }
 0x271   :  { %v342_v38 = vpop.f32.mrf.mxu0 }
 0x272   :  { %v343_v39 = vadd.f32 %v369_v37, %v342_v38 }
 0x273   :  { %v445_v40 = vpop.f32.mrf.mxu0 }
 0x274   :  { %349 = vst.msk [vmem:[%s658_s7] sm:$0xff] %vm348_vm2, %v343_v39 }
 0x275   :  { %v345_v41 = vpop.f32.mrf.mxu0 }
 0x277   :  { %v446_v42 = vpop.f32.mrf.mxu0 }
 0x278   :  { %354 = vsyncpa [#allocation3], 1 }
 0x279   :  { %355 = vsyncpa [#allocation5], 1 }

</bundles_post_ra>
